<compile_context>
chip_gen: v5e
topology: v5e:2x2
jax: 0.10.0
libtpu: 0.0.40
codegen_flags: <defaults>
</compile_context>

<pallas_src>
import functools
import math

import jax
import jax.numpy as jnp
from jax.experimental import pallas as pl
from jax.experimental.pallas import tpu as pltpu


def _ceil_to(x, m):
    return -(-x // m) * m


def _critic_kernel(x_ref, w1_ref, b1_ref, w2_ref, b2_ref, w3t_ref, bias_ref,
                   out_ref, pooled_ref, *, cb, n_pad, n_chunks):
    """One grid step: tb batch elements streamed as n_chunks sub-chunks of
    cb batches (cb * n_pad rows) each."""
    c2 = w2_ref.shape[1]
    rows_chunk = cb * n_pad

    # Tiny weights: cast once per grid step -> single-pass bf16 MXU inputs.
    w1 = w1_ref[...].astype(jnp.bfloat16)
    w2 = w2_ref[...].astype(jnp.bfloat16)
    b1 = b1_ref[...]
    b2 = b2_ref[...]

    def body(j, carry):
        r0 = pl.multiple_of(j * rows_chunk, 8)            # n_pad % 8 == 0
        x = x_ref[pl.ds(r0, rows_chunk), :].astype(jnp.bfloat16)

        h1 = jnp.dot(x, w1, preferred_element_type=jnp.float32) + b1
        h1 = jnp.maximum(h1, 0.0)                          # (rows_chunk, C1)
        h2 = jnp.dot(h1.astype(jnp.bfloat16), w2,
                     preferred_element_type=jnp.float32) + b2
        h2 = jnp.maximum(h2, 0.0)                          # (rows_chunk, C2)

        # Node reduction (reassociated fc3).  The reshape is a pure retiling
        # because n_pad % 8 == 0; the sum is a sublane reduction.
        pooled = jnp.sum(h2.reshape(cb, n_pad, c2), axis=1)   # (cb, C2)

        p0 = j * cb
        if cb % 8 == 0:
            p0 = pl.multiple_of(p0, 8)
        pooled_ref[pl.ds(p0, cb), :] = pooled
        return carry

    jax.lax.fori_loop(0, n_chunks, body, 0)

    # value[b] = pooled[b, :] . w3 + (N * b3 - node-pad correction),
    # emitted as one lane-dense (1, tb) row.
    out_ref[...] = (jnp.dot(w3t_ref[...], pooled_ref[...].T,
                            preferred_element_type=jnp.float32)
                    + bias_ref[...])


def critic_forward(x, w1, b1, w2, b2, w3, b3, *, block_batch=None,
                   chunk_batch=None, target_block_bytes=4 << 20,
                   x_block_vmem_bytes=24 << 20, vmem_limit_bytes=48 << 20):
    """x: (B, N, H) float32 or bfloat16 -> value: (B,) float32."""
    B, N, H = x.shape
    C1 = w1.shape[1]  # 20
    C2 = w2.shape[1]  # 20

    # --- node axis: rows-per-batch must be a sublane multiple (8) -------------
    n_pad = _ceil_to(N, 8)
    if n_pad != N:
        # TODO(synk): this jnp.pad is one extra HBM pass over x; supply node
        # counts that are multiples of 8 (or pre-padded inputs) to skip it.
        x = jnp.pad(x, ((0, 0), (0, n_pad - N), (0, 0)))
    x2d = x.reshape(B * n_pad, H)        # free reshape; no batch padding at all

    # --- tile-size heuristics -------------------------------------------------
    itemsize = x2d.dtype.itemsize
    # Sub-chunk size (batches): ~1K rows of lane-padded intermediates.
    cb = max(1, min(128, 1024 // n_pad))
    if cb >= 8:
        cb = (cb // 8) * 8
    cb = min(cb, max(1, B))
    if chunk_batch is not None:
        cb = max(1, chunk_batch)

    if block_batch is not None:
        tb = max(1, block_batch)
    else:
        # >= target_block_bytes of x HBM traffic per grid step, capped by the
        # VMEM budget of the double-buffered x block (lane padding included).
        lane_h = _ceil_to(H, 128)
        rows_target = max(n_pad, target_block_bytes // (H * itemsize))
        rows_target = min(rows_target,
                          max(n_pad, (x_block_vmem_bytes // 2)
                              // (lane_h * itemsize)))
        tb = max(cb, (rows_target // n_pad) // cb * cb)
        b_ceil = _ceil_to(B, cb)
        tb = min(tb, b_ceil)
        if b_ceil > cb:
            # Keep >= 2 grid tiles so the "parallel" batch axis can feed both
            # TensorCores on v7x.
            tb = min(tb, _ceil_to(-(-b_ceil // 2), cb))
        tb = max(tb, cb)
    cb = min(cb, tb)
    if tb % cb:
        cb = math.gcd(tb, cb)
    n_chunks = tb // cb
    g = -(-B // tb)
    rows_block = tb * n_pad

    # --- fold fc3 bias and zero-pad node-row leakage into one scalar ----------
    # Padded node rows have x == 0, so their h2 is the constant
    # relu(relu(b1) @ W2 + b2); remove (n_pad - N) copies of its projection.
    h1_pad = jnp.maximum(b1, 0.0)
    h2_pad = jnp.maximum(jnp.dot(h1_pad, w2) + b2, 0.0)
    out_bias = (jnp.float32(N) * b3
                - jnp.float32(n_pad - N) * jnp.dot(h2_pad, w3)
                ).astype(jnp.float32)                      # (1, 1)

    kernel = functools.partial(_critic_kernel, cb=cb, n_pad=n_pad,
                               n_chunks=n_chunks)

    out = pl.pallas_call(
        kernel,
        out_shape=jax.ShapeDtypeStruct((g, tb), jnp.float32),
        grid_spec=pltpu.PrefetchScalarGridSpec(
            num_scalar_prefetch=0,
            grid=(g,),
            in_specs=[
                pl.BlockSpec((rows_block, H), lambda i: (i, 0)),  # x row slab
                pl.BlockSpec((H, C1), lambda i: (0, 0)),          # W1 (resident)
                pl.BlockSpec((1, C1), lambda i: (0, 0)),          # b1
                pl.BlockSpec((C1, C2), lambda i: (0, 0)),         # W2
                pl.BlockSpec((1, C2), lambda i: (0, 0)),          # b2
                pl.BlockSpec((1, C2), lambda i: (0, 0)),          # W3^T
                pl.BlockSpec((1, 1), lambda i: (0, 0)),           # folded bias
            ],
            out_specs=pl.BlockSpec((1, tb), lambda i: (i, 0)),    # lane-dense
            scratch_shapes=[pltpu.VMEM((tb, C2), jnp.float32)],   # pooled sums
        ),
        compiler_params=pltpu.CompilerParams(
            dimension_semantics=("parallel",),
            vmem_limit_bytes=vmem_limit_bytes,
        ),
    )(x2d, w1, b1, w2, b2, w3.T, out_bias)

    # Lanes >= B of the last tile hold garbage from out-of-bounds batch rows;
    # they are sliced off here and never read.
    return out.reshape(g * tb)[:B]


def init_params(key, hidden_node_dim):
    """Deterministic synthetic params, stored as (in, out) — equivalent to the
    Conv1d weight (out, in, 1) transposed.  Biases are nonzero so the padded
    node-row constant-correction path is actually exercised."""
    k1, k2, k3, k4, k5, k6 = jax.random.split(key, 6)
    w1 = jax.random.normal(k1, (hidden_node_dim, 20), jnp.float32) * 0.1
    b1 = jax.random.normal(k4, (1, 20), jnp.float32) * 0.1
    w2 = jax.random.normal(k2, (20, 20), jnp.float32) * 0.1
    b2 = jax.random.normal(k5, (1, 20), jnp.float32) * 0.1
    w3 = jax.random.normal(k3, (20, 1), jnp.float32) * 0.1
    b3 = jax.random.normal(k6, (1, 1), jnp.float32) * 0.1
    return w1, b1, w2, b2, w3, b3


def critic_reference(x, w1, b1, w2, b2, w3, b3):
    h1 = jax.nn.relu(jnp.einsum("bnh,hc->bnc", x, w1) + b1[0])
    h2 = jax.nn.relu(jnp.einsum("bnc,cd->bnd", h1, w2) + b2[0])
    h3 = jnp.einsum("bnd,de->bne", h2, w3) + b3[0]
    return h3.sum(axis=1)[:, 0]


if __name__ == "__main__":
    key = jax.random.PRNGKey(0)
    kx, kp, kx2, kx3 = jax.random.split(key, 4)

    # Tolerances: the MXU inputs are bf16 (single-pass) with f32 accumulation.
    ATOL = RTOL = 3e-2

    # Case 1: batch=2, nodes=8, hidden_node_dim=32 — single tile, no padding.
    B, N, H = 2, 8, 32
    x = jax.random.normal(kx, (B, N, H), jnp.float32)
    params = init_params(kp, H)
    value = jax.block_until_ready(critic_forward(x, *params))
    ref = critic_reference(x, *params)
    assert value.shape == (B,)
    assert jnp.allclose(value, ref, atol=ATOL, rtol=RTOL), (value, ref)

    # Case 2: ragged shapes — node padding (N=7) with constant correction,
    # partial last batch tile (out-of-bounds block rows), multi-step grid,
    # multi-chunk inner loop.
    B2, N2 = 5, 7
    x2 = jax.random.normal(kx2, (B2, N2, H), jnp.float32)
    value2 = jax.block_until_ready(
        critic_forward(x2, *params, block_batch=2, chunk_batch=1))
    ref2 = critic_reference(x2, *params)
    assert value2.shape == (B2,)
    assert jnp.allclose(value2, ref2, atol=ATOL, rtol=RTOL), (value2, ref2)

    # Case 3: default heuristics — 2 "parallel" grid tiles, 128-batch
    # sub-chunks in the fori_loop, lane-dense (1, 256) output rows.
    B3, N3 = 384, 8
    x3 = jax.random.normal(kx3, (B3, N3, H), jnp.float32)
    value3 = jax.block_until_ready(critic_forward(x3, *params))
    ref3 = critic_reference(x3, *params)
    assert value3.shape == (B3,)
    assert jnp.allclose(value3, ref3, atol=ATOL, rtol=RTOL), (value3, ref3)

    print("KERNEL_OK")
</pallas_src>

<mosaic_0001>
module attributes {stable_mosaic.version = 11 : i64} {
  func.func @_critic_kernel(%arg0: i32, %arg1: memref<16x32xf32, #tpu.memory_space<vmem>>, %arg2: memref<32x20xf32, #tpu.memory_space<vmem>>, %arg3: memref<1x20xf32, #tpu.memory_space<vmem>>, %arg4: memref<20x20xf32, #tpu.memory_space<vmem>>, %arg5: memref<1x20xf32, #tpu.memory_space<vmem>>, %arg6: memref<1x20xf32, #tpu.memory_space<vmem>>, %arg7: memref<1x1xf32, #tpu.memory_space<vmem>>, %arg8: memref<1x2xf32, #tpu.memory_space<vmem>>, %arg9: memref<2x20xf32, #tpu.memory_space<vmem>>) attributes {dimension_semantics = [#tpu.dimension_semantics<parallel>], iteration_bounds = array<i64: 1>, scalar_prefetch = 0 : i64, scratch_operands = 1 : i64, tpu.core_type = #tpu.core_type<tc>, window_params = [{transform_indices = @transform_0, window_bounds = array<i64: 16, 32>}, {pipeline_mode = #tpu.pipeline_mode<synchronous>, transform_indices = @transform_1, window_bounds = array<i64: 32, 20>}, {pipeline_mode = #tpu.pipeline_mode<synchronous>, transform_indices = @transform_2, window_bounds = array<i64: 1, 20>}, {pipeline_mode = #tpu.pipeline_mode<synchronous>, transform_indices = @transform_3, window_bounds = array<i64: 20, 20>}, {pipeline_mode = #tpu.pipeline_mode<synchronous>, transform_indices = @transform_4, window_bounds = array<i64: 1, 20>}, {pipeline_mode = #tpu.pipeline_mode<synchronous>, transform_indices = @transform_5, window_bounds = array<i64: 1, 20>}, {pipeline_mode = #tpu.pipeline_mode<synchronous>, transform_indices = @transform_6, window_bounds = array<i64: 1, 1>}, {transform_indices = @transform_7, window_bounds = array<i64: 1, 2>}]} {
    %c0 = arith.constant 0 : index
    %c0_0 = arith.constant 0 : index
    %0 = vector.load %arg2[%c0, %c0_0] : memref<32x20xf32, #tpu.memory_space<vmem>>, vector<32x20xf32>
    %1 = arith.truncf %0 : vector<32x20xf32> to vector<32x20xbf16>
    %c0_1 = arith.constant 0 : index
    %c0_2 = arith.constant 0 : index
    %2 = vector.load %arg4[%c0_1, %c0_2] : memref<20x20xf32, #tpu.memory_space<vmem>>, vector<20x20xf32>
    %3 = arith.truncf %2 : vector<20x20xf32> to vector<20x20xbf16>
    %c0_3 = arith.constant 0 : index
    %c0_4 = arith.constant 0 : index
    %4 = vector.load %arg3[%c0_3, %c0_4] : memref<1x20xf32, #tpu.memory_space<vmem>>, vector<1x20xf32>
    %c0_5 = arith.constant 0 : index
    %c0_6 = arith.constant 0 : index
    %5 = vector.load %arg5[%c0_5, %c0_6] : memref<1x20xf32, #tpu.memory_space<vmem>>, vector<1x20xf32>
    %c0_i32 = arith.constant 0 : i32
    %c16_i32 = arith.constant 16 : i32
    %6 = arith.muli %c0_i32, %c16_i32 : i32
    %7 = tpu.assume_multiple %6, 8 : i32
    %8 = arith.index_cast %7 : i32 to index
    %c0_7 = arith.constant 0 : index
    %9 = vector.load %arg1[%8, %c0_7] : memref<16x32xf32, #tpu.memory_space<vmem>>, vector<16x32xf32>
    %10 = arith.truncf %9 : vector<16x32xf32> to vector<16x32xbf16>
    %cst = arith.constant dense<0.000000e+00> : vector<16x20xf32>
    %11 = tpu.matmul %10, %1, %cst {dimension_numbers = #tpu.dot_dimension_numbers<[1], [0], [0], [1], [0, 0, 1, 1], [], []>} : vector<16x32xbf16>, vector<32x20xbf16>, vector<16x20xf32> -> vector<16x20xf32>
    %12 = vector.broadcast %4 : vector<1x20xf32> to vector<16x20xf32>
    %13 = arith.addf %11, %12 : vector<16x20xf32>
    %cst_8 = arith.constant 0.000000e+00 : f32
    %14 = vector.broadcast %cst_8 : f32 to vector<16x20xf32>
    %15 = arith.maximumf %13, %14 : vector<16x20xf32>
    %16 = arith.truncf %15 : vector<16x20xf32> to vector<16x20xbf16>
    %cst_9 = arith.constant dense<0.000000e+00> : vector<16x20xf32>
    %17 = tpu.matmul %16, %3, %cst_9 {dimension_numbers = #tpu.dot_dimension_numbers<[1], [0], [0], [1], [0, 0, 1, 1], [], []>} : vector<16x20xbf16>, vector<20x20xbf16>, vector<16x20xf32> -> vector<16x20xf32>
    %18 = vector.broadcast %5 : vector<1x20xf32> to vector<16x20xf32>
    %19 = arith.addf %17, %18 : vector<16x20xf32>
    %cst_10 = arith.constant 0.000000e+00 : f32
    %20 = vector.broadcast %cst_10 : f32 to vector<16x20xf32>
    %21 = arith.maximumf %19, %20 : vector<16x20xf32>
    %22 = vector.shape_cast %21 : vector<16x20xf32> to vector<2x8x20xf32>
    %cst_11 = arith.constant dense<0.000000e+00> : vector<2x20xf32>
    %23 = vector.multi_reduction <add>, %22, %cst_11 [1] : vector<2x8x20xf32> to vector<2x20xf32>
    %c2_i32 = arith.constant 2 : i32
    %24 = arith.muli %c0_i32, %c2_i32 : i32
    %25 = arith.index_cast %24 : i32 to index
    %c0_12 = arith.constant 0 : index
    %26 = vector.load %arg9[%25, %c0_12] : memref<2x20xf32, #tpu.memory_space<vmem>>, vector<2x20xf32>
    tpu.vector_store %arg9[%25, %c0_12], %23 {strides = array<i32>} : memref<2x20xf32, #tpu.memory_space<vmem>>, vector<2x20xf32>,
    %c1_i32 = arith.constant 1 : i32
    %c0_13 = arith.constant 0 : index
    %c0_14 = arith.constant 0 : index
    %27 = vector.load %arg6[%c0_13, %c0_14] : memref<1x20xf32, #tpu.memory_space<vmem>>, vector<1x20xf32>
    %c0_15 = arith.constant 0 : index
    %c0_16 = arith.constant 0 : index
    %28 = vector.load %arg9[%c0_15, %c0_16] : memref<2x20xf32, #tpu.memory_space<vmem>>, vector<2x20xf32>
    %29 = tpu.transpose %28, [1, 0] : vector<2x20xf32> -> vector<20x2xf32>
    %cst_17 = arith.constant dense<0.000000e+00> : vector<1x2xf32>
    %30 = tpu.matmul %27, %29, %cst_17 {dimension_numbers = #tpu.dot_dimension_numbers<[1], [0], [0], [1], [0, 0, 1, 1], [], []>} : vector<1x20xf32>, vector<20x2xf32>, vector<1x2xf32> -> vector<1x2xf32>
    %c0_18 = arith.constant 0 : index
    %c0_19 = arith.constant 0 : index
    %31 = vector.load %arg7[%c0_18, %c0_19] : memref<1x1xf32, #tpu.memory_space<vmem>>, vector<1x1xf32>
    %32 = vector.broadcast %31 : vector<1x1xf32> to vector<1x2xf32>
    %33 = arith.addf %30, %32 : vector<1x2xf32>
    %c0_20 = arith.constant 0 : index
    %c0_21 = arith.constant 0 : index
    %34 = vector.load %arg8[%c0_20, %c0_21] : memref<1x2xf32, #tpu.memory_space<vmem>>, vector<1x2xf32>
    tpu.vector_store %arg8[%c0_20, %c0_21], %33 {strides = array<i32>} : memref<1x2xf32, #tpu.memory_space<vmem>>, vector<1x2xf32>,
    return
  }
  func.func @transform_0(%arg0: i32) -> (i32, i32) {
    %c0_i32 = arith.constant 0 : i32
    %c0_i32_0 = arith.constant 0 : i32
    return %arg0, %c0_i32 : i32, i32
  }
  func.func @transform_1(%arg0: i32) -> (i32, i32) {
    %c0_i32 = arith.constant 0 : i32
    %c0_i32_0 = arith.constant 0 : i32
    %c0_i32_1 = arith.constant 0 : i32
    return %c0_i32, %c0_i32_0 : i32, i32
  }
  func.func @transform_2(%arg0: i32) -> (i32, i32) {
    %c0_i32 = arith.constant 0 : i32
    %c0_i32_0 = arith.constant 0 : i32
    %c0_i32_1 = arith.constant 0 : i32
    return %c0_i32, %c0_i32_0 : i32, i32
  }
  func.func @transform_3(%arg0: i32) -> (i32, i32) {
    %c0_i32 = arith.constant 0 : i32
    %c0_i32_0 = arith.constant 0 : i32
    %c0_i32_1 = arith.constant 0 : i32
    return %c0_i32, %c0_i32_0 : i32, i32
  }
  func.func @transform_4(%arg0: i32) -> (i32, i32) {
    %c0_i32 = arith.constant 0 : i32
    %c0_i32_0 = arith.constant 0 : i32
    %c0_i32_1 = arith.constant 0 : i32
    return %c0_i32, %c0_i32_0 : i32, i32
  }
  func.func @transform_5(%arg0: i32) -> (i32, i32) {
    %c0_i32 = arith.constant 0 : i32
    %c0_i32_0 = arith.constant 0 : i32
    %c0_i32_1 = arith.constant 0 : i32
    return %c0_i32, %c0_i32_0 : i32, i32
  }
  func.func @transform_6(%arg0: i32) -> (i32, i32) {
    %c0_i32 = arith.constant 0 : i32
    %c0_i32_0 = arith.constant 0 : i32
    %c0_i32_1 = arith.constant 0 : i32
    return %c0_i32, %c0_i32_0 : i32, i32
  }
  func.func @transform_7(%arg0: i32) -> (i32, i32) {
    %c0_i32 = arith.constant 0 : i32
    %c0_i32_0 = arith.constant 0 : i32
    return %arg0, %c0_i32 : i32, i32
  }
}

</mosaic_0001>

<bundles_post_ra>
// kernel: tpu_custom_call.1
= control target key start
LH: loop header
LB: loop body
LE: loop exit
PB: predicated region body
PF: predicated region fallthrough
CT: control target
= control target key end

     0   :  { %s295_s0 = inlined_call_operand.vmem [shape: f32[16,32], index: 0, kind: input, shape index: {}]   ;;  %s296_s1 = inlined_call_operand.vmem [shape: f32[32,20], index: 1, kind: input, shape index: {}]   ;;  %s297_s2 = inlined_call_operand.vmem [shape: f32[1,20], index: 2, kind: input, shape index: {}]   ;;  %s298_s3 = inlined_call_operand.vmem [shape: f32[20,20], index: 3, kind: input, shape index: {}]   ;;  %s299_s4 = inlined_call_operand.vmem [shape: f32[1,20], index: 4, kind: input, shape index: {}]   ;;  %s300_s5 = inlined_call_operand.vmem [shape: f32[1,20], index: 5, kind: input, shape index: {}]   ;;  %s301_s6 = inlined_call_operand.<no memory space> [shape: f32[1,1], index: 6, kind: input, shape index: {}]   ;;  %s302_s7 = inlined_call_operand.hbm [shape: f32[1,2], index: 7, kind: output, shape index: {}]  }
   0x1   :  { %v12_v0 = vstv %s301_s6 }
   0x2   :  { %13 = vst [vmem:[#allocation3] sm:$0x1] %v12_v0 }
   0x3   :  { %v32_v1 = vld [vmem:[%s296_s1 + $0x10] sm:$0xff]  ;;  %v33_v2 = vld [vmem:[%s296_s1 + $0x18] sm:$0xff]  ;;  %v30_v3 = vld [vmem:[%s296_s1] sm:$0xff] }
   0x4   :  { %v35_v4 = vpack.c.bf16 %v33_v2, %v32_v1  ;;  %v31_v5 = vld [vmem:[%s296_s1 + $0x8] sm:$0xff]  ;;  %v43_v7 = vld [vmem:[%s295_s0] sm:$0xff] }
   0x5   :  { %v34_v6 = vpack.c.bf16 %v31_v5, %v30_v3  ;;  %v44_v8 = vld [vmem:[%s295_s0 + $0x8] sm:$0xff] }
   0x6   :  { %59 = vmatpush.bf16.msra.mxu0 %v35_v4 }
   0x7   :  { %14 = vsyncpa [#allocation5], 0  ;;  %v45_v9 = vpack.c.bf16 %v44_v8, %v43_v7  ;;  %vm49_vm0 = vcmask 261120   ;;  %v38_v10 = vld [vmem:[%s298_s3 + $0x10] sm:$0xf]  ;;  %vm77_vm1 = vcmask 1041408  }
   0x8   :  { %v40_v11 = vpack.c.bf16 %v38_v10, %v38_v10  ;;  %v36_v13 = vld [vmem:[%s298_s3] sm:$0xff]  ;;  %v37_v14 = vld [vmem:[%s298_s3 + $0x8] sm:$0xff]  ;;  %vm73_vm2 = vcmask 162816   ;;  %v206_v31 = vmov 0   ;;  %vm113_vm3 = vcmask 1041409   ;;  %s162_s25 = sshll.u32 %s302_s7, 4  ;;  %s163_s25 = int_to_ptr.hbm [resolvable:$true] %s162_s25 }
   0x9   :  { %v39_v15 = vpack.c.bf16 %v37_v14, %v36_v13  ;;  %v178_v17 = vld [vmem:[%s297_s2] ss:$0 sm:$0xff]  ;;  %v120_v30 = vld [vmem:[#allocation3] sm:$0x1]  ;;  %177 = vset.pattern.permute.xlu0 %v206_v31  ;;  %vm116_vm4 = vcmask 156672   ;;  %vm153_vm5 = vcmask 8192  }
   0xa   :  { %60 = vmatpush.bf16.msra.mxu0 %v34_v6  ;;  %v79_v12 = vsel %vm77_vm1, %v40_v11, 0  ;;  %v179_v24 = vld [vmem:[%s299_s4] ss:$0 sm:$0xff]  ;;  %123 = vperm.xlu0 %177, %v120_v30   ;;  %s207_s4 = smov [#allocation4]  }
   0xb   :  { %87 = vmatpush.bf16.msra.mxu1 %v79_v12  ;;  %v118_v49 = vld [vmem:[%s300_s5] sm:$0x1]  ;;  %s160_s22 = sshll.u32 %s207_s4, 4  ;;  %s161_s22 = int_to_ptr.vmem [resolvable:$true] %s160_s22 }
   0xd   :  { %171 = vmatmul.msk.bf16.vlgmr.msra.gmra.mxu0 %vm49_vm0, %v45_v9 }
   0xf   :  { %88 = vmatpush.bf16.msra.mxu1 %v39_v15 }
  0x7c   :  { %v124_v50 = vpop.permute.xlu0 %123 }
  0x7d   :  { %v126_v51 = vperm.slane %v124_v50, 0 }
  0x8a   :  { %v62_v16 = vpop.f32.mrf.mxu0 }
  0x8b   :  { %v63_v18 = vadd.f32 %v178_v17, %v62_v16 }
  0x8d   :  { %v67_v21 = vmax.f32 %v63_v18, 0.0 }
  0x92   :  { %v64_v19 = vpop.f32.mrf.mxu0 }
  0x93   :  { %v65_v20 = vadd.f32 %v178_v17, %v64_v19 }
  0x95   :  { %v68_v22 = vmax.f32 %v65_v20, 0.0 }
  0x97   :  { %v69_v23 = vpack.c.bf16 %v68_v22, %v67_v21 }
  0x99   :  { %172 = vmatmul.msk.bf16.vlgmr.msra.gmra.mxu1 %vm73_vm2, %v69_v23 }
 0x116   :  { %v90_v25 = vpop.f32.mrf.mxu1 }
 0x117   :  { %v91_v26 = vadd.f32 %v179_v24, %v90_v25 }
 0x119   :  { %v95_v27 = vmax.f32 %v91_v26, 0.0 }
 0x11b   :  { %v97_v28 = vsel %vm73_vm2, %v95_v27, 0.0 }
 0x11c   :  { %v98_v29 = vrot.slane %v97_v28, 4 }
 0x11e   :  { %v99_v32 = vadd.f32 %v98_v29, %v97_v28  ;;  %v92_v33 = vpop.f32.mrf.mxu1 }
 0x11f   :  { %v93_v34 = vadd.f32 %v179_v24, %v92_v33 }
 0x120   :  { %v100_v36 = vrot.slane %v99_v32, 2 }
 0x121   :  { %v96_v35 = vmax.f32 %v93_v34, 0.0 }
 0x122   :  { %v101_v39 = vadd.f32 %v100_v36, %v99_v32 }
 0x123   :  { %v104_v37 = vsel %vm73_vm2, %v96_v35, 0.0 }
 0x124   :  { %v105_v38 = vrot.slane %v104_v37, 4  ;;  %v102_v42 = vrot.slane %v101_v39, 1 }
 0x126   :  { %v106_v40 = vadd.f32 %v105_v38, %v104_v37  ;;  %v103_v45 = vadd.f32 %v102_v42, %v101_v39 }
 0x128   :  { %v107_v41 = vrot.slane %v106_v40, 2 }
 0x12a   :  { %v108_v43 = vadd.f32 %v107_v41, %v106_v40 }
 0x12c   :  { %v109_v44 = vrot.slane %v108_v43, 1 }
 0x12e   :  { %v110_v46 = vadd.f32 %v109_v44, %v108_v43 }
 0x130   :  { %v114_v47 = vsel %vm113_vm3, %v110_v46, %v103_v45 }
 0x131   :  { %117 = vst.msk [vmem:[#allocation2] sm:$0x3] %vm116_vm4, %v114_v47 }
 0x138   :  { %v119_v48 = vld [vmem:[#allocation2] sm:$0x3] }
 0x139   :  { %173 = vmatpush.xpose.msk.msra.mxu2 %vm73_vm2, %v119_v48 }
 0x13c   :  { %174 = vmatmul.msk.f32.vlgmr.msra.gmra.mxu2 %vm73_vm2, %v118_v49 }
 0x1bf   :  { %v150_v52 = vpop.f32.mrf.mxu2 }
 0x1c0   :  { %v151_v53 = vadd.f32 %v150_v52, %v126_v51 }
 0x1c2   :  { %154 = vst.msk [vmem:[#allocation4] sm:$0x1] %vm153_vm5, %v151_v53 }
 0x1c3   :  { %165 = dma.vmem_to_hbm [thread:$0]  %s161_s22, 16, %s163_s25, [#allocation5]  }
 0x1c4   :  { %204 = dma.done.wait [#allocation5], 16  }
 0x1c5   :  { %205 = vsyncadd [#allocation5], 4294967280 }
 0x1c6   :  { %170 = vsyncpa [#allocation5], 1 }

</bundles_post_ra>
